<compile_context>
chip_gen: v7x
topology: tpu7x:2x2x1
jax: 0.10.0
libtpu: 0.0.40
codegen_flags: <defaults>
</compile_context>

<pallas_src>
import jax
import jax.numpy as jnp
from jax.experimental import pallas as pl
from jax.experimental.pallas import tpu as pltpu

_LANE = 128


def _round_up(n, m):
    return ((n + m - 1) // m) * m


def _lstm_kernel(idx_ref,                  # (B, 1)   int32  token ids for this step
                 h0_ref, c0_ref,           # (B, H)   f32    initial state
                 wx_ref,                   # (nIn, G) bf16   E @ W_ih^T   (fused emb+input gates)
                 wh_ref,                   # (H, G)   bf16   W_hh^T
                 bg_ref,                   # (1, G)   f32    b_ih + b_hh
                 wfc_ref,                  # (H, Np)  bf16   W_fc^T
                 bfc_ref,                  # (1, Np)  f32    b_fc
                 out_ref,                  # (B, Np)  f32    per-step logits
                 hN_ref, cN_ref):          # (B, H)   f32    carried state (resident)
    """One grid step == one LSTM time step.  Weights are VMEM-resident across the
    whole grid (constant index_maps); h/c are carried in the resident hN/cN blocks."""
    t = pl.program_id(0)
    B, H = h0_ref.shape
    nIn = wx_ref.shape[0]

    @pl.when(t == 0)
    def _():
        hN_ref[...] = h0_ref[...]
        cN_ref[...] = c0_ref[...]

    # Embedding lookup as a one-hot MXU pass (one-hot is exact in bf16, so this
    # selects the precomputed E @ W_ih^T row exactly).
    idx = idx_ref[...]                                                    # (B, 1) int32
    onehot = (jax.lax.broadcasted_iota(jnp.int32, (B, nIn), 1) == idx
              ).astype(jnp.bfloat16)                                      # (B, nIn)

    h_prev = hN_ref[...]                                                  # (B, H) f32
    gates = (jnp.dot(onehot, wx_ref[...], preferred_element_type=jnp.float32)
             + jnp.dot(h_prev.astype(jnp.bfloat16), wh_ref[...],
                       preferred_element_type=jnp.float32)
             + bg_ref[...])                                               # (B, G) f32

    # PyTorch gate order i, f, g, o; each gate is an H-wide column block.
    i_g = jax.nn.sigmoid(gates[:, 0 * H:1 * H])
    f_g = jax.nn.sigmoid(gates[:, 1 * H:2 * H])
    g_g = jnp.tanh(gates[:, 2 * H:3 * H])
    o_g = jax.nn.sigmoid(gates[:, 3 * H:4 * H])

    c_new = f_g * cN_ref[...] + i_g * g_g
    h_new = o_g * jnp.tanh(c_new)
    cN_ref[...] = c_new
    hN_ref[...] = h_new

    # fc_out: (B, H) @ (H, Np) + b   (lane-dense 128-wide output block)
    out_ref[...] = (jnp.dot(h_new.astype(jnp.bfloat16), wfc_ref[...],
                            preferred_element_type=jnp.float32) + bfc_ref[...])


def _run_lstm(x_seq, h0, c0, params):
    """x_seq: (T, B) int32; h0/c0: (B, H) f32.  Returns (out:(T,B,Np), hN, cN)."""
    T, B = x_seq.shape
    H = params["nHidden"]
    G, Np = params["G"], params["Np"]
    nIn = params["w_x"].shape[0]

    # Constant index_map => block fetched once, stays VMEM-resident for all T steps.
    const2 = lambda shape: pl.BlockSpec(shape, lambda t: (0, 0))

    out, hN, cN = pl.pallas_call(
        _lstm_kernel,
        grid=(T,),
        out_shape=(
            jax.ShapeDtypeStruct((T, B, Np), jnp.float32),
            jax.ShapeDtypeStruct((B, H), jnp.float32),
            jax.ShapeDtypeStruct((B, H), jnp.float32),
        ),
        in_specs=[
            pl.BlockSpec((None, B, 1), lambda t: (t, 0, 0)),   # per-step token ids
            const2((B, H)),                                    # h0
            const2((B, H)),                                    # c0
            const2((nIn, G)),                                  # E @ W_ih^T  (bf16)
            const2((H, G)),                                    # W_hh^T      (bf16)
            const2((1, G)),                                    # gate bias
            const2((H, Np)),                                   # W_fc^T      (bf16)
            const2((1, Np)),                                   # fc bias
        ],
        out_specs=(
            pl.BlockSpec((None, B, Np), lambda t: (t, 0, 0)),  # per-step logits
            const2((B, H)),                                    # h_n (resident carry)
            const2((B, H)),                                    # c_n (resident carry)
        ),
        # In-place state update: h0 -> h_n, c0 -> c_n (inputs 1,2 -> outputs 1,2).
        input_output_aliases={1: 1, 2: 2},
        compiler_params=pltpu.CompilerParams(
            dimension_semantics=("arbitrary",)),               # time axis is sequential
    )(x_seq.reshape(T, B, 1).astype(jnp.int32), h0, c0,
      params["w_x"], params["w_h"], params["b_g"],
      params["w_fc"], params["b_fc"])
    return out, hN, cN


def delayed_lstm_forward(x_idx, hidden, params):
    """Single-step forward matching Delayed_LSTM.forward:
       x_idx:(B,) int -> (out:(B, nOut), (h_n, c_n) each (1, B, H))."""
    h0, c0 = hidden
    B = x_idx.shape[0]
    H, nOut = params["nHidden"], params["nOut"]
    h0p = h0.reshape(B, H).astype(jnp.float32)
    c0p = c0.reshape(B, H).astype(jnp.float32)
    out, hN, cN = _run_lstm(x_idx.reshape(1, B), h0p, c0p, params)
    return out[0, :, :nOut], (hN.reshape(1, B, H), cN.reshape(1, B, H))


def delayed_lstm_forward_steps(x_seq, hidden, params):
    """T fused time steps in ONE pallas_call (weights DMA'd once, state carried in
    VMEM).  Numerically equivalent to T sequential delayed_lstm_forward calls."""
    h0, c0 = hidden
    T, B = x_seq.shape
    H, nOut = params["nHidden"], params["nOut"]
    out, hN, cN = _run_lstm(x_seq,
                            h0.reshape(B, H).astype(jnp.float32),
                            c0.reshape(B, H).astype(jnp.float32), params)
    return out[:, :, :nOut], (hN.reshape(1, B, H), cN.reshape(1, B, H))


def init_params(key, nIn, nHidden, nOut):
    """Synthetic init with the same parameter shapes as nn.Embedding/nn.LSTM/nn.Linear,
    then pre-fused / pre-transposed into the compact TPU layouts used by the kernel."""
    ks = jax.random.split(key, 7)
    H = nHidden
    scale = 1.0 / float(H) ** 0.5
    G = _round_up(4 * H, _LANE)          # gate width (4H = 128 exactly for H=32)
    Np = _round_up(nOut, _LANE)          # lane-dense fc output width

    emb = jax.random.normal(ks[0], (nIn, H), jnp.float32)
    w_ih = jax.random.uniform(ks[1], (4 * H, H), jnp.float32, -scale, scale)
    w_hh = jax.random.uniform(ks[2], (4 * H, H), jnp.float32, -scale, scale)
    b_ih = jax.random.uniform(ks[3], (4 * H,), jnp.float32, -scale, scale)
    b_hh = jax.random.uniform(ks[4], (4 * H,), jnp.float32, -scale, scale)
    w_fc = jax.random.uniform(ks[5], (nOut, H), jnp.float32, -scale, scale)
    b_fc = jax.random.uniform(ks[6], (nOut,), jnp.float32, -scale, scale)

    # Fuse the embedding lookup with the input-side gate matmul (f32 precompute):
    #   x @ W_ih^T == onehot(idx) @ (E @ W_ih^T)
    w_x = jnp.zeros((nIn, G), jnp.float32).at[:, :4 * H].set(emb @ w_ih.T)
    w_h = jnp.zeros((H, G), jnp.float32).at[:, :4 * H].set(w_hh.T)
    b_g = jnp.zeros((G,), jnp.float32).at[:4 * H].set(b_ih + b_hh)
    w_fc_T = jnp.zeros((H, Np), jnp.float32).at[:, :nOut].set(w_fc.T)
    b_fc_p = jnp.zeros((Np,), jnp.float32).at[:nOut].set(b_fc)

    return {
        "nHidden": H, "nOut": nOut, "G": G, "Np": Np,
        "w_x": w_x.astype(jnp.bfloat16),       # (nIn, G) bf16
        "w_h": w_h.astype(jnp.bfloat16),       # (H, G)   bf16
        "b_g": b_g.reshape(1, G),              # (1, G)   f32
        "w_fc": w_fc_T.astype(jnp.bfloat16),   # (H, Np)  bf16
        "b_fc": b_fc_p.reshape(1, Np),         # (1, Np)  f32
        # raw f32 parameters, kept for the pure-JAX reference check
        "ref": dict(emb=emb, w_ih=w_ih, w_hh=w_hh, b_ih=b_ih, b_hh=b_hh,
                    w_fc=w_fc, b_fc=b_fc),
    }


def _reference_forward(x_seq, hidden, params):
    """Pure-JAX f32 reference of the PyTorch module, run over T steps."""
    r = params["ref"]
    H = params["nHidden"]
    h = hidden[0][0].astype(jnp.float32)
    c = hidden[1][0].astype(jnp.float32)
    outs = []
    for t in range(x_seq.shape[0]):
        x = r["emb"][x_seq[t]]
        gates = x @ r["w_ih"].T + h @ r["w_hh"].T + r["b_ih"] + r["b_hh"]
        i = jax.nn.sigmoid(gates[:, 0 * H:1 * H])
        f = jax.nn.sigmoid(gates[:, 1 * H:2 * H])
        g = jnp.tanh(gates[:, 2 * H:3 * H])
        o = jax.nn.sigmoid(gates[:, 3 * H:4 * H])
        c = f * c + i * g
        h = o * jnp.tanh(c)
        outs.append(h @ r["w_fc"].T + r["b_fc"])
    return jnp.stack(outs), h, c


if __name__ == "__main__":
    key = jax.random.PRNGKey(0)
    nIn, nHidden, nOut, batch = 64, 32, 16, 8

    k_param, k_idx = jax.random.split(key)
    params = init_params(k_param, nIn, nHidden, nOut)

    def zeros_hidden():
        # initHidden equivalent: zeros of shape (bi * n_layers, B, H) = (1, B, H)
        return (jnp.zeros((1, batch, nHidden), jnp.float32),
                jnp.zeros((1, batch, nHidden), jnp.float32))

    x_idx = jax.random.randint(k_idx, (batch,), 0, nIn, dtype=jnp.int32)

    # --- single step (exactly the module's forward) ---
    out, (h_n, c_n) = delayed_lstm_forward(x_idx, zeros_hidden(), params)
    jax.block_until_ready((out, h_n, c_n))

    assert out.shape == (batch, nOut)
    assert h_n.shape == (1, batch, nHidden) and c_n.shape == (1, batch, nHidden)
    assert bool(jnp.all(jnp.isfinite(out)))

    # correctness vs pure-JAX f32 reference (kernel uses bf16 weights -> loose tol)
    ref_out, ref_h, ref_c = _reference_forward(x_idx[None, :], zeros_hidden(), params)
    assert float(jnp.max(jnp.abs(out - ref_out[0]))) < 5e-2
    assert float(jnp.max(jnp.abs(h_n[0] - ref_h))) < 5e-2
    assert float(jnp.max(jnp.abs(c_n[0] - ref_c))) < 5e-2

    # --- T fused steps in one pallas_call == T sequential single-step calls ---
    T = 4
    x_seq = jax.random.randint(jax.random.PRNGKey(1), (T, batch), 0, nIn, dtype=jnp.int32)
    fused_out, (fh, fcell) = delayed_lstm_forward_steps(x_seq, zeros_hidden(), params)

    h_cur = zeros_hidden()
    step_outs = []
    for t in range(T):
        o_t, h_cur = delayed_lstm_forward(x_seq[t], h_cur, params)
        step_outs.append(o_t)
    step_outs = jnp.stack(step_outs)
    jax.block_until_ready((fused_out, step_outs))

    assert float(jnp.max(jnp.abs(fused_out - step_outs))) < 1e-4
    assert float(jnp.max(jnp.abs(fh - h_cur[0]))) < 1e-4
    assert float(jnp.max(jnp.abs(fcell - h_cur[1]))) < 1e-4

    print("KERNEL_OK")
</pallas_src>

<mosaic_0001>
module attributes {stable_mosaic.version = 11 : i64} {
  func.func @_lstm_kernel(%arg0: i32, %arg1: memref<1x8x1xi32, #tpu.memory_space<vmem>>, %arg2: memref<8x32xf32, #tpu.memory_space<vmem>>, %arg3: memref<8x32xf32, #tpu.memory_space<vmem>>, %arg4: memref<64x128xbf16, #tpu.memory_space<vmem>>, %arg5: memref<32x128xbf16, #tpu.memory_space<vmem>>, %arg6: memref<1x128xf32, #tpu.memory_space<vmem>>, %arg7: memref<32x128xbf16, #tpu.memory_space<vmem>>, %arg8: memref<1x128xf32, #tpu.memory_space<vmem>>, %arg9: memref<1x8x128xf32, #tpu.memory_space<vmem>>, %arg10: memref<8x32xf32, #tpu.memory_space<vmem>>, %arg11: memref<8x32xf32, #tpu.memory_space<vmem>>) attributes {dimension_semantics = [#tpu.dimension_semantics<arbitrary>], iteration_bounds = array<i64: 1>, scalar_prefetch = 0 : i64, scratch_operands = 0 : i64, tpu.core_type = #tpu.core_type<tc>, window_params = [{transform_indices = @transform_0, window_bounds = array<i64: 1, 8, 1>}, {pipeline_mode = #tpu.pipeline_mode<synchronous>, transform_indices = @transform_1, window_bounds = array<i64: 8, 32>}, {pipeline_mode = #tpu.pipeline_mode<synchronous>, transform_indices = @transform_2, window_bounds = array<i64: 8, 32>}, {pipeline_mode = #tpu.pipeline_mode<synchronous>, transform_indices = @transform_3, window_bounds = array<i64: 64, 128>}, {pipeline_mode = #tpu.pipeline_mode<synchronous>, transform_indices = @transform_4, window_bounds = array<i64: 32, 128>}, {pipeline_mode = #tpu.pipeline_mode<synchronous>, transform_indices = @transform_5, window_bounds = array<i64: 1, 128>}, {pipeline_mode = #tpu.pipeline_mode<synchronous>, transform_indices = @transform_6, window_bounds = array<i64: 32, 128>}, {pipeline_mode = #tpu.pipeline_mode<synchronous>, transform_indices = @transform_7, window_bounds = array<i64: 1, 128>}, {transform_indices = @transform_8, window_bounds = array<i64: 1, 8, 128>}, {pipeline_mode = #tpu.pipeline_mode<synchronous>, transform_indices = @transform_9, window_bounds = array<i64: 8, 32>}, {pipeline_mode = #tpu.pipeline_mode<synchronous>, transform_indices = @transform_10, window_bounds = array<i64: 8, 32>}]} {
    %c0_i32 = arith.constant 0 : i32
    %0 = arith.cmpi eq, %arg0, %c0_i32 : i32
    %1 = arith.extui %0 : i1 to i32
    %c0_i32_0 = arith.constant 0 : i32
    %2 = arith.cmpi ne, %1, %c0_i32_0 : i32
    scf.if %2 {
      %c0_29 = arith.constant 0 : index
      %c0_30 = arith.constant 0 : index
      %58 = vector.load %arg2[%c0_29, %c0_30] : memref<8x32xf32, #tpu.memory_space<vmem>>, vector<8x32xf32>
      %c0_31 = arith.constant 0 : index
      %c0_32 = arith.constant 0 : index
      %59 = vector.load %arg10[%c0_31, %c0_32] : memref<8x32xf32, #tpu.memory_space<vmem>>, vector<8x32xf32>
      tpu.vector_store %arg10[%c0_31, %c0_32], %58 {strides = array<i32>} : memref<8x32xf32, #tpu.memory_space<vmem>>, vector<8x32xf32>,
      %c0_33 = arith.constant 0 : index
      %c0_34 = arith.constant 0 : index
      %60 = vector.load %arg3[%c0_33, %c0_34] : memref<8x32xf32, #tpu.memory_space<vmem>>, vector<8x32xf32>
      %c0_35 = arith.constant 0 : index
      %c0_36 = arith.constant 0 : index
      %61 = vector.load %arg11[%c0_35, %c0_36] : memref<8x32xf32, #tpu.memory_space<vmem>>, vector<8x32xf32>
      tpu.vector_store %arg11[%c0_35, %c0_36], %60 {strides = array<i32>} : memref<8x32xf32, #tpu.memory_space<vmem>>, vector<8x32xf32>,
    } else {
    }
    %c0 = arith.constant 0 : index
    %c0_1 = arith.constant 0 : index
    %c0_2 = arith.constant 0 : index
    %3 = vector.load %arg1[%c0, %c0_1, %c0_2] : memref<1x8x1xi32, #tpu.memory_space<vmem>>, vector<1x8x1xi32>
    %4 = vector.shape_cast %3 : vector<1x8x1xi32> to vector<8x1xi32>
    %5 = tpu.iota {dimensions = array<i32: 1>} : vector<8x64xi32>
    %6 = vector.broadcast %4 : vector<8x1xi32> to vector<8x64xi32>
    %7 = arith.cmpi eq, %5, %6 : vector<8x64xi32>
    %8 = arith.extui %7 : vector<8x64xi1> to vector<8x64xi32>
    %9 = arith.sitofp %8 : vector<8x64xi32> to vector<8x64xf32>
    %10 = arith.truncf %9 : vector<8x64xf32> to vector<8x64xbf16>
    %c0_3 = arith.constant 0 : index
    %c0_4 = arith.constant 0 : index
    %11 = vector.load %arg10[%c0_3, %c0_4] : memref<8x32xf32, #tpu.memory_space<vmem>>, vector<8x32xf32>
    %c0_5 = arith.constant 0 : index
    %c0_6 = arith.constant 0 : index
    %12 = vector.load %arg4[%c0_5, %c0_6] : memref<64x128xbf16, #tpu.memory_space<vmem>>, vector<64x128xbf16>
    %cst = arith.constant dense<0.000000e+00> : vector<8x128xf32>
    %13 = tpu.matmul %10, %12, %cst {dimension_numbers = #tpu.dot_dimension_numbers<[1], [0], [0], [1], [0, 0, 1, 1], [], []>} : vector<8x64xbf16>, vector<64x128xbf16>, vector<8x128xf32> -> vector<8x128xf32>
    %14 = arith.truncf %11 : vector<8x32xf32> to vector<8x32xbf16>
    %c0_7 = arith.constant 0 : index
    %c0_8 = arith.constant 0 : index
    %15 = vector.load %arg5[%c0_7, %c0_8] : memref<32x128xbf16, #tpu.memory_space<vmem>>, vector<32x128xbf16>
    %cst_9 = arith.constant dense<0.000000e+00> : vector<8x128xf32>
    %16 = tpu.matmul %14, %15, %cst_9 {dimension_numbers = #tpu.dot_dimension_numbers<[1], [0], [0], [1], [0, 0, 1, 1], [], []>} : vector<8x32xbf16>, vector<32x128xbf16>, vector<8x128xf32> -> vector<8x128xf32>
    %17 = arith.addf %13, %16 : vector<8x128xf32>
    %c0_10 = arith.constant 0 : index
    %c0_11 = arith.constant 0 : index
    %18 = vector.load %arg6[%c0_10, %c0_11] : memref<1x128xf32, #tpu.memory_space<vmem>>, vector<1x128xf32>
    %19 = vector.broadcast %18 : vector<1x128xf32> to vector<8x128xf32>
    %20 = arith.addf %17, %19 : vector<8x128xf32>
    %21 = vector.extract_strided_slice %20 {offsets = [0, 0], sizes = [8, 32], strides = [1, 1]} : vector<8x128xf32> to vector<8x32xf32>
    %22 = arith.negf %21 : vector<8x32xf32>
    %23 = math.exp %22 : vector<8x32xf32>
    %cst_12 = arith.constant 1.000000e+00 : f32
    %24 = vector.broadcast %cst_12 : f32 to vector<8x32xf32>
    %25 = arith.addf %24, %23 : vector<8x32xf32>
    %26 = arith.divf %24, %25 : vector<8x32xf32>
    %27 = vector.extract_strided_slice %20 {offsets = [0, 32], sizes = [8, 32], strides = [1, 1]} : vector<8x128xf32> to vector<8x32xf32>
    %28 = arith.negf %27 : vector<8x32xf32>
    %29 = math.exp %28 : vector<8x32xf32>
    %cst_13 = arith.constant 1.000000e+00 : f32
    %30 = vector.broadcast %cst_13 : f32 to vector<8x32xf32>
    %31 = arith.addf %30, %29 : vector<8x32xf32>
    %32 = arith.divf %30, %31 : vector<8x32xf32>
    %33 = vector.extract_strided_slice %20 {offsets = [0, 64], sizes = [8, 32], strides = [1, 1]} : vector<8x128xf32> to vector<8x32xf32>
    %34 = math.tanh %33 : vector<8x32xf32>
    %35 = vector.extract_strided_slice %20 {offsets = [0, 96], sizes = [8, 32], strides = [1, 1]} : vector<8x128xf32> to vector<8x32xf32>
    %36 = arith.negf %35 : vector<8x32xf32>
    %37 = math.exp %36 : vector<8x32xf32>
    %cst_14 = arith.constant 1.000000e+00 : f32
    %38 = vector.broadcast %cst_14 : f32 to vector<8x32xf32>
    %39 = arith.addf %38, %37 : vector<8x32xf32>
    %40 = arith.divf %38, %39 : vector<8x32xf32>
    %c0_15 = arith.constant 0 : index
    %c0_16 = arith.constant 0 : index
    %41 = vector.load %arg11[%c0_15, %c0_16] : memref<8x32xf32, #tpu.memory_space<vmem>>, vector<8x32xf32>
    %42 = arith.mulf %32, %41 : vector<8x32xf32>
    %43 = arith.mulf %26, %34 : vector<8x32xf32>
    %44 = arith.addf %42, %43 : vector<8x32xf32>
    %45 = math.tanh %44 : vector<8x32xf32>
    %46 = arith.mulf %40, %45 : vector<8x32xf32>
    %c0_17 = arith.constant 0 : index
    %c0_18 = arith.constant 0 : index
    %47 = vector.load %arg11[%c0_17, %c0_18] : memref<8x32xf32, #tpu.memory_space<vmem>>, vector<8x32xf32>
    tpu.vector_store %arg11[%c0_17, %c0_18], %44 {strides = array<i32>} : memref<8x32xf32, #tpu.memory_space<vmem>>, vector<8x32xf32>,
    %c0_19 = arith.constant 0 : index
    %c0_20 = arith.constant 0 : index
    %48 = vector.load %arg10[%c0_19, %c0_20] : memref<8x32xf32, #tpu.memory_space<vmem>>, vector<8x32xf32>
    tpu.vector_store %arg10[%c0_19, %c0_20], %46 {strides = array<i32>} : memref<8x32xf32, #tpu.memory_space<vmem>>, vector<8x32xf32>,
    %49 = arith.truncf %46 : vector<8x32xf32> to vector<8x32xbf16>
    %c0_21 = arith.constant 0 : index
    %c0_22 = arith.constant 0 : index
    %50 = vector.load %arg7[%c0_21, %c0_22] : memref<32x128xbf16, #tpu.memory_space<vmem>>, vector<32x128xbf16>
    %cst_23 = arith.constant dense<0.000000e+00> : vector<8x128xf32>
    %51 = tpu.matmul %49, %50, %cst_23 {dimension_numbers = #tpu.dot_dimension_numbers<[1], [0], [0], [1], [0, 0, 1, 1], [], []>} : vector<8x32xbf16>, vector<32x128xbf16>, vector<8x128xf32> -> vector<8x128xf32>
    %c0_24 = arith.constant 0 : index
    %c0_25 = arith.constant 0 : index
    %52 = vector.load %arg8[%c0_24, %c0_25] : memref<1x128xf32, #tpu.memory_space<vmem>>, vector<1x128xf32>
    %53 = vector.broadcast %52 : vector<1x128xf32> to vector<8x128xf32>
    %54 = arith.addf %51, %53 : vector<8x128xf32>
    %c0_26 = arith.constant 0 : index
    %c0_27 = arith.constant 0 : index
    %c0_28 = arith.constant 0 : index
    %55 = vector.load %arg9[%c0_26, %c0_27, %c0_28] : memref<1x8x128xf32, #tpu.memory_space<vmem>>, vector<1x8x128xf32>
    %56 = vector.shape_cast %55 : vector<1x8x128xf32> to vector<8x128xf32>
    %57 = vector.shape_cast %54 : vector<8x128xf32> to vector<1x8x128xf32>
    tpu.vector_store %arg9[%c0_26, %c0_27, %c0_28], %57 {strides = array<i32>} : memref<1x8x128xf32, #tpu.memory_space<vmem>>, vector<1x8x128xf32>,
    return
  }
  func.func @transform_0(%arg0: i32) -> (i32, i32, i32) {
    %c0_i32 = arith.constant 0 : i32
    %c0_i32_0 = arith.constant 0 : i32
    %c0_i32_1 = arith.constant 0 : i32
    return %arg0, %c0_i32, %c0_i32_0 : i32, i32, i32
  }
  func.func @transform_1(%arg0: i32) -> (i32, i32) {
    %c0_i32 = arith.constant 0 : i32
    %c0_i32_0 = arith.constant 0 : i32
    %c0_i32_1 = arith.constant 0 : i32
    return %c0_i32, %c0_i32_0 : i32, i32
  }
  func.func @transform_2(%arg0: i32) -> (i32, i32) {
    %c0_i32 = arith.constant 0 : i32
    %c0_i32_0 = arith.constant 0 : i32
    %c0_i32_1 = arith.constant 0 : i32
    return %c0_i32, %c0_i32_0 : i32, i32
  }
  func.func @transform_3(%arg0: i32) -> (i32, i32) {
    %c0_i32 = arith.constant 0 : i32
    %c0_i32_0 = arith.constant 0 : i32
    %c0_i32_1 = arith.constant 0 : i32
    return %c0_i32, %c0_i32_0 : i32, i32
  }
  func.func @transform_4(%arg0: i32) -> (i32, i32) {
    %c0_i32 = arith.constant 0 : i32
    %c0_i32_0 = arith.constant 0 : i32
    %c0_i32_1 = arith.constant 0 : i32
    return %c0_i32, %c0_i32_0 : i32, i32
  }
  func.func @transform_5(%arg0: i32) -> (i32, i32) {
    %c0_i32 = arith.constant 0 : i32
    %c0_i32_0 = arith.constant 0 : i32
    %c0_i32_1 = arith.constant 0 : i32
    return %c0_i32, %c0_i32_0 : i32, i32
  }
  func.func @transform_6(%arg0: i32) -> (i32, i32) {
    %c0_i32 = arith.constant 0 : i32
    %c0_i32_0 = arith.constant 0 : i32
    %c0_i32_1 = arith.constant 0 : i32
    return %c0_i32, %c0_i32_0 : i32, i32
  }
  func.func @transform_7(%arg0: i32) -> (i32, i32) {
    %c0_i32 = arith.constant 0 : i32
    %c0_i32_0 = arith.constant 0 : i32
    %c0_i32_1 = arith.constant 0 : i32
    return %c0_i32, %c0_i32_0 : i32, i32
  }
  func.func @transform_8(%arg0: i32) -> (i32, i32, i32) {
    %c0_i32 = arith.constant 0 : i32
    %c0_i32_0 = arith.constant 0 : i32
    %c0_i32_1 = arith.constant 0 : i32
    return %arg0, %c0_i32, %c0_i32_0 : i32, i32, i32
  }
  func.func @transform_9(%arg0: i32) -> (i32, i32) {
    %c0_i32 = arith.constant 0 : i32
    %c0_i32_0 = arith.constant 0 : i32
    %c0_i32_1 = arith.constant 0 : i32
    return %c0_i32, %c0_i32_0 : i32, i32
  }
  func.func @transform_10(%arg0: i32) -> (i32, i32) {
    %c0_i32 = arith.constant 0 : i32
    %c0_i32_0 = arith.constant 0 : i32
    %c0_i32_1 = arith.constant 0 : i32
    return %c0_i32, %c0_i32_0 : i32, i32
  }
}

</mosaic_0001>

<bundles_post_ra>
// kernel: tpu_custom_call.1
= control target key start
LH: loop header
LB: loop body
LE: loop exit
PB: predicated region body
PF: predicated region fallthrough
CT: control target
= control target key end

     0   :  { %16 = vsyncpa [#allocation3], 0  ;;  %s810_s0 = inlined_call_operand.vmem [shape: s32[1,8,1], index: 0, kind: input, shape index: {}]   ;;  %s811_s1 = inlined_call_operand.hbm [shape: f32[8,32], index: 1, kind: input, shape index: {}, may-alias: {1,9}]   ;;  %s812_s2 = inlined_call_operand.hbm [shape: f32[8,32], index: 2, kind: input, shape index: {}, may-alias: {2,10}]   ;;  %s813_s3 = inlined_call_operand.vmem [shape: bf16[64,128], index: 3, kind: input, shape index: {}]   ;;  %s814_s4 = inlined_call_operand.vmem [shape: bf16[32,128], index: 4, kind: input, shape index: {}]   ;;  %s815_s5 = inlined_call_operand.vmem [shape: f32[1,128], index: 5, kind: input, shape index: {}]   ;;  %s816_s6 = inlined_call_operand.hbm [shape: bf16[32,128], index: 6, kind: input, shape index: {}]   ;;  %s817_s7 = inlined_call_operand.vmem [shape: f32[1,128], index: 7, kind: input, shape index: {}]   ;;  %s818_s8 = inlined_call_operand.hbm [shape: f32[1,8,128], index: 8, kind: output, shape index: {0}]   ;;  %s819_s9 = inlined_call_operand.hbm [shape: f32[8,32], index: 9, kind: output, shape index: {1}, may-alias: {1,9}]   ;;  %s820_s10 = inlined_call_operand.hbm [shape: f32[8,32], index: 10, kind: output, shape index: {2}, may-alias: {2,10}]  }
   0x1   :  { %17 = vsyncpa [#allocation6], 0 }
   0x2   :  { %18 = vsyncpa [#allocation4], 0 }
   0x3   :  { %19 = vsyncpa [#allocation10], 0  ;;  %s614_s13 = smov [#allocation5]   ;;  %s615_s15 = smov [#allocation2]  }
   0x4   :  { %s38_s14 = sshll.u32 %s614_s13, 4  ;;  %s28_s16 = sshll.u32 %s615_s15, 4  ;;  %s39_s14 = int_to_ptr.vmem [resolvable:$true] %s38_s14  ;;  %s29_s16 = int_to_ptr.vmem [resolvable:$true] %s28_s16 }
   0x5   :  { %s474_s19 = scalar_lea.hbm %s812_s2, 128 }
   0x6   :  { %p475_p0 = scmp.ne.s32.totalorder %s812_s2, %s474_s19  ;;  %p478_p1 = scmp.lt.u32.totalorder %s474_s19, %s812_s2 }
   0x8   :  { %p480_p2 = pnand %p478_p1, %p475_p0 }
   0xa   :  { %483 = shalt.err (!%p480_p2)
}
   0xb   :  { %s484_s24 = scalar_lea.vmem %s39_s14, 128  ;;  %p489_p4 = scmp.lt.s32.totalorder %s39_s14, %s39_s14 }
   0xc   :  { %p485_p3 = scmp.ne.s32.totalorder %s39_s14, %s484_s24  ;;  %p490_p5 = scmp.lt.s32.totalorder %s484_s24, %s484_s24 }
   0xe   :  { %p491_p6 = por %p490_p5, %p489_p4 }
  0x10   :  { %p492_p7 = pnand %p491_p6, %p485_p3 }
  0x12   :  { %495 = shalt.err (!%p492_p7)
}
  0x13   :  { %41 = dma.hbm_to_vmem [thread:$0]  %s812_s2, 128, %s39_s14, [#allocation6]  }
  0x14   :  { %s496_s29 = scalar_lea.hbm %s811_s1, 128 }
  0x15   :  { %p497_p8 = scmp.ne.s32.totalorder %s811_s1, %s496_s29  ;;  %p500_p9 = scmp.lt.u32.totalorder %s496_s29, %s811_s1 }
  0x17   :  { %p502_p10 = pnand %p500_p9, %p497_p8 }
  0x19   :  { %505 = shalt.err (!%p502_p10)
}
  0x1a   :  { %s506_s15 = scalar_lea.vmem %s29_s16, 128  ;;  %p511_p12 = scmp.lt.s32.totalorder %s29_s16, %s29_s16 }
  0x1b   :  { %p507_p11 = scmp.ne.s32.totalorder %s29_s16, %s506_s15  ;;  %p512_p13 = scmp.lt.s32.totalorder %s506_s15, %s506_s15 }
  0x1d   :  { %p513_p0 = por %p512_p13, %p511_p12 }
  0x1f   :  { %p514_p1 = pnand %p513_p0, %p507_p11 }
  0x21   :  { %517 = shalt.err (!%p514_p1)
}
  0x22   :  { %31 = dma.hbm_to_vmem [thread:$0]  %s811_s1, 128, %s29_s16, [#allocation3]  }
  0x23   :  { %s616_s17 = smov [#allocation7]   ;;  %s518_s21 = scalar_lea.hbm %s816_s6, 256 }
  0x24   :  { %s53_s18 = sshll.u32 %s616_s17, 4  ;;  %p519_p2 = scmp.ne.s32.totalorder %s816_s6, %s518_s21  ;;  %s54_s18 = int_to_ptr.vmem [resolvable:$true] %s53_s18 }
  0x25   :  { %p522_p3 = scmp.lt.u32.totalorder %s518_s21, %s816_s6 }
  0x27   :  { %p524_p4 = pnand %p522_p3, %p519_p2 }
  0x29   :  { %527 = shalt.err (!%p524_p4)
}
  0x2a   :  { %s528_s26 = scalar_lea.vmem %s54_s18, 256  ;;  %p533_p6 = scmp.lt.s32.totalorder %s54_s18, %s54_s18 }
  0x2b   :  { %p529_p5 = scmp.ne.s32.totalorder %s54_s18, %s528_s26  ;;  %p534_p7 = scmp.lt.s32.totalorder %s528_s26, %s528_s26 }
  0x2d   :  { %p535_p8 = por %p534_p7, %p533_p6 }
  0x2f   :  { %p536_p9 = pnand %p535_p8, %p529_p5 }
  0x31   :  { %539 = shalt.err (!%p536_p9)
}
  0x32   :  { %s617_s1 = smov 64   ;;  %s618_s16 = smov 4  }
  0x33   :  { %59 = dma.hbm_to_vmem [thread:$0]  %s816_s6, 256, %s54_s18, [#allocation6], %s617_s1, %s617_s1, %s618_s16  }
  0x34   :  { %606 = dma.done.wait [#allocation3], 128  }
  0x35   :  { %607 = vsyncadd [#allocation3], 4294967168 }
  0x36   :  { %608 = dma.done.wait [#allocation6], 384  }
  0x37   :  { %609 = vsyncadd [#allocation6], 4294966912  ;;  %v619_v0 = vmov 0   ;;  %v620_v1 = vmov 0.0   ;;  %v81_v2 = vld [vmem:[%s810_s0] sm:$0xff]  ;;  %vm621_vm0 = vmmov 0   ;;  %v82_v14 = vlaneseq }
  0x38   :  { %457 = vset.pattern.permute.xlu0 %v619_v0  ;;  %424 = vmatprep.subr.bf16.mxu1 %v620_v1  ;;  %v458_v3 = vld [vmem:[%s813_s3] sm:$0xff]   ;;  %v459_v4 = vld [vmem:[%s813_s3 + $0x8] sm:$0xff]   ;;  %vm77_vm1 = vcmask 261120   ;;  %v461_v9 = vld [vmem:[%s813_s3 + $0x10] sm:$0xff]   ;;  %s622_s20 = smov 32   ;;  %vm185_vm3 = vcmask 523264  }
  0x39   :  { %416 = vmatprep.subr.bf16.mxu0 %v620_v1  ;;  %85 = vperm.xlu0 %457, %v81_v2   ;;  %v460_v5 = vld [vmem:[%s814_s4] sm:$0xff]   ;;  %v462_v6 = vld [vmem:[%s814_s4 + $0x8] sm:$0xff]   ;;  %v463_v10 = vld [vmem:[%s813_s3 + $0x18] sm:$0xff]   ;;  %v83_v15 = vand.u32 127, %v82_v14  ;;  %s624_s22 = smov [#allocation9]  }
  0x3a   :  { %420 = vmatprep.mubr.msk.bf16.mxu0 %vm621_vm0, %v620_v1  ;;  %432 = vmatprep.mubr.msk.bf16.mxu1 %vm621_vm0, %v620_v1  ;;  %v76_v7 = vld [vmem:[#allocation2] sm:$0xff]  ;;  %v79_v8 = vld [vmem:[#allocation5] sm:$0xff]  ;;  %v464_v41 = vld [vmem:[#allocation7] sm:$0xff]   ;;  %s363_s23 = sshll.u32 %s624_s22, 4  ;;  %s364_s23 = int_to_ptr.vmem [resolvable:$true] %s363_s23 }
  0x3b   :  { %425 = vmatpush3.bf16.msra.mxu1 %v458_v3  ;;  %417 = vmatpush3.bf16.msra.mxu0 %v460_v5  ;;  %78 = vst.msk [vmem:[#allocation9] sm:$0xff] %vm77_vm1, %v76_v7  ;;  %80 = vst.msk [vmem:[#allocation11] sm:$0xff] %vm77_vm1, %v79_v8  ;;  %v399_v24 = vld [vmem:[%s815_s5] ss:$0 sm:$0xff]  ;;  %v465_v42 = vld [vmem:[#allocation7 + $0x8] sm:$0xff]   ;;  %s623_s5 = smov 96   ;;  %p545_p11 = scmp.lt.s32.totalorder %s364_s23, %s364_s23 }
  0x3c   :  { %426 = vmatprep.subr.bf16.mxu1 %v620_v1  ;;  %418 = vmatprep.subr.bf16.mxu0 %v620_v1  ;;  %s540_s24 = scalar_lea.vmem %s364_s23, 128 }
  0x3d   :  { %p541_p10 = scmp.ne.s32.totalorder %s364_s23, %s540_s24  ;;  %p546_p12 = scmp.lt.s32.totalorder %s540_s24, %s540_s24 }
  0x3f   :  { %427 = vmatpush3.bf16.msra.mxu1 %v459_v4  ;;  %419 = vmatpush3.bf16.msra.mxu0 %v462_v6  ;;  %p547_p13 = por %p546_p12, %p545_p11 }
  0x40   :  { %428 = vmatprep.subr.bf16.mxu1 %v620_v1  ;;  %436 = vmatprep.subr.bf16.mxu0 %v620_v1 }
  0x41   :  { %p548_p0 = pnand %p547_p13, %p541_p10 }
  0x42   :  { %v91_v11 = vld [vmem:[#allocation9] sm:$0xff]  ;;  %v244_v12 = vld [vmem:[#allocation11] sm:$0xff] }
  0x43   :  { %429 = vmatpush3.bf16.msra.mxu1 %v461_v9  ;;  %v100_v13 = vpack.c.bf16 %v91_v11, %v91_v11  ;;  %246 = vrot.lane.b32.xlu1 %v244_v12, %s622_s20 }
  0x44   :  { %430 = vmatprep.subr.bf16.mxu1 %v620_v1 }
  0x45   :  { %421 = vmatmul.mubr.msk.bf16.vlgmr.msra.gmra.mrb[0].mxu0 %vm77_vm1, %v100_v13 }
  0x46   :  { %440 = vmatprep.mubr.msk.bf16.mxu0 %vm621_vm0, %v620_v1  ;;  %437 = vmatpush3.bf16.msra.mxu0 %v464_v41 }
  0x47   :  { %431 = vmatpush3.bf16.msra.mxu1 %v463_v10  ;;  %438 = vmatprep.subr.bf16.mxu0 %v620_v1 }
  0x4a   :  { %439 = vmatpush3.bf16.msra.mxu0 %v465_v42 }
  0xb5   :  { %v247_v37 = vpop.permute.xlu1 %246 }
  0xb8   :  { %v86_v16 = vpop.permute.xlu0 %85 }
  0xb9   :  { %vm87_vm2 = vcmp.eq.s32.totalorder %v83_v15, %v86_v16 }
  0xba   :  { %v390_v17 = vsel %vm87_vm2, 1.0, %v620_v1 }
  0xbb   :  { %v90_v18 = vpack.c.bf16 %v390_v17, %v390_v17 }
  0xbd   :  { %433 = vmatmul.mubr.msk.bf16.vlgmr.msra.gmra.mrb[0].mxu1 %vm185_vm3, %v90_v18 }
 0x118   :  { %v155_v19 = vpop.f32.mrb[0].mxu0 }
 0x119   :  { %v422_v20 = vpop.f32.mrb[1].mxu0 }
 0x11a   :  { %v158_v21 = vpop.f32.mrb[2].mxu0 }
 0x11b   :  { %v423_v22 = vpop.f32.mrb[3].mxu0 }
 0x190   :  { %v223_v23 = vpop.f32.mrb[0].mxu1 }
 0x191   :  { %v224_v25 = vadd.f32 %v223_v23, %v155_v19  ;;  %v434_v26 = vpop.f32.mrb[1].mxu1 }
 0x192   :  { %v226_v27 = vpop.f32.mrb[2].mxu1 }
 0x193   :  { %v236_v28 = vadd.f32 %v399_v24, %v224_v25  ;;  %v435_v29 = vpop.f32.mrb[3].mxu1 }
 0x195   :  { %466 = vtanh.f32 %v236_v28  ;;  %v400_v31 = vmul.f32 -1.442695, %v236_v28 }
 0x197   :  { %468 = vpow2.f32 %v400_v31 }
 0x19f   :  { %v467_v30 = vpop.eup %466 }
 0x1a0   :  { %251 = vrot.lane.b32.xlu0 %v467_v30, %s617_s1 }
 0x1a1   :  { %v469_v32 = vpop.eup %468 }
 0x1a2   :  { %v240_v33 = vadd.f32 1.0, %v469_v32 }
 0x1a4   :  { %470 = vrcp.f32 %v240_v33 }
 0x1ae   :  { %v471_v34 = vpop.eup %470 }
 0x1af   :  { %v249_v38 = vmul.f32 %v471_v34, %v247_v37 }
 0x212   :  { %v252_v35 = vpop.permute.xlu0 %251 }
 0x213   :  { %v254_v36 = vmul.f32 %v471_v34, %v252_v35 }
 0x215   :  { %256 = vrot.lane.b32.xlu1 %v254_v36, %s622_s20 }
 0x287   :  { %v257_v39 = vpop.permute.xlu1 %256 }
 0x288   :  { %v259_v40 = vadd.f32 %v257_v39, %v249_v38 }
 0x28a   :  { %472 = vtanh.f32 %v259_v40 }
 0x294   :  { %v473_v43 = vpop.eup %472 }
 0x295   :  { %262 = vrot.lane.b32.xlu0 %v473_v43, %s617_s1 }
 0x307   :  { %v263_v44 = vpop.permute.xlu0 %262 }
 0x308   :  { %v265_v45 = vmul.f32 %v471_v34, %v263_v44 }
 0x30a   :  { %v276_v46 = vpack.c.bf16 %v265_v45, %v265_v45  ;;  %272 = vrot.lane.b32.xlu0 %v265_v45, %s622_s20 }
 0x30c   :  { %289 = vrot.lane.b32.xlu1 %v276_v46, %s622_s20 }
 0x310   :  { %267 = vrot.lane.b32.xlu1 %v259_v40, %s623_s5 }
 0x37c   :  { %v273_v47 = vpop.permute.xlu0 %272 }
 0x37d   :  { %275 = vst.msk [vmem:[#allocation9] sm:$0xff] %vm77_vm1, %v273_v47 }
 0x37e   :  { %v290_v48 = vpop.permute.xlu1 %289 }
 0x37f   :  { %441 = vmatmul.mubr.msk.bf16.vlgmr.msra.gmra.mrb[4].mxu0 %vm77_vm1, %v290_v48 }
 0x382   :  { %v268_v49 = vpop.permute.xlu1 %267 }
 0x383   :  { %270 = vst.msk [vmem:[#allocation11] sm:$0xff] %vm77_vm1, %v268_v49 }
 0x384   :  { %551 = shalt.err (!%p548_p0)
}
 0x385   :  { %s552_s1 = scalar_lea.hbm %s819_s9, 128 }
 0x386   :  { %p553_p1 = scmp.ne.s32.totalorder %s819_s9, %s552_s1  ;;  %p556_p2 = scmp.lt.u32.totalorder %s552_s1, %s819_s9 }
 0x388   :  { %p558_p3 = pnand %p556_p2, %p553_p1 }
 0x38a   :  { %561 = shalt.err (!%p558_p3)
}
 0x38b   :  { %366 = dma.vmem_to_hbm [thread:$0]  %s364_s23, 128, %s819_s9, [#allocation10]  }
 0x38c   :  { %s625_s12 = smov [#allocation11]  }
 0x38d   :  { %s373_s6 = sshll.u32 %s625_s12, 4  ;;  %s374_s6 = int_to_ptr.vmem [resolvable:$true] %s373_s6 }
 0x38e   :  { %s562_s13 = scalar_lea.vmem %s374_s6, 128  ;;  %p567_p5 = scmp.lt.s32.totalorder %s374_s6, %s374_s6 }
 0x38f   :  { %p563_p4 = scmp.ne.s32.totalorder %s374_s6, %s562_s13  ;;  %p568_p6 = scmp.lt.s32.totalorder %s562_s13, %s562_s13 }
 0x391   :  { %p569_p7 = por %p568_p6, %p567_p5 }
 0x393   :  { %p570_p8 = pnand %p569_p7, %p563_p4 }
 0x395   :  { %573 = shalt.err (!%p570_p8)
}
 0x396   :  { %s574_s0 = scalar_lea.hbm %s820_s10, 128 }
 0x397   :  { %p575_p9 = scmp.ne.s32.totalorder %s820_s10, %s574_s0  ;;  %p578_p10 = scmp.lt.u32.totalorder %s574_s0, %s820_s10 }
 0x399   :  { %p580_p11 = pnand %p578_p10, %p575_p9 }
 0x39b   :  { %583 = shalt.err (!%p580_p11)
}
 0x39c   :  { %376 = dma.vmem_to_hbm [thread:$0]  %s374_s6, 128, %s820_s10, [#allocation10]   ;;  %v401_v50 = vld [vmem:[%s817_s7] ss:$0 sm:$0xff] }
 0x39d   :  { %s626_s21 = smov [#allocation8]  }
 0x39e   :  { %s353_s5 = sshll.u32 %s626_s21, 4  ;;  %s354_s5 = int_to_ptr.vmem [resolvable:$true] %s353_s5 }
 0x39f   :  { %s584_s22 = scalar_lea.vmem %s354_s5, 128  ;;  %p589_p13 = scmp.lt.s32.totalorder %s354_s5, %s354_s5 }
 0x3a0   :  { %p585_p12 = scmp.ne.s32.totalorder %s354_s5, %s584_s22  ;;  %p590_p0 = scmp.lt.s32.totalorder %s584_s22, %s584_s22 }
 0x3a2   :  { %p591_p1 = por %p590_p0, %p589_p13 }
 0x3a4   :  { %p592_p2 = pnand %p591_p1, %p585_p12 }
 0x452   :  { %v340_v51 = vpop.f32.mrb[4].mxu0 }
 0x453   :  { %v341_v52 = vadd.f32 %v401_v50, %v340_v51  ;;  %v442_v53 = vpop.f32.mrb[5].mxu0 }
 0x454   :  { %v343_v54 = vpop.f32.mrb[6].mxu0 }
 0x455   :  { %346 = vst [vmem:[#allocation8] sm:$0xff] %v341_v52  ;;  %v443_v55 = vpop.f32.mrb[7].mxu0 }
 0x456   :  { %595 = shalt.err (!%p592_p2)
}
 0x457   :  { %s596_s7 = scalar_lea.hbm %s818_s8, 128 }
 0x458   :  { %p597_p3 = scmp.ne.s32.totalorder %s818_s8, %s596_s7  ;;  %p600_p4 = scmp.lt.u32.totalorder %s596_s7, %s818_s8 }
 0x45a   :  { %p602_p5 = pnand %p600_p4, %p597_p3 }
 0x45c   :  { %605 = shalt.err (!%p602_p5)
}
 0x45d   :  { %356 = dma.vmem_to_hbm [thread:$0]  %s354_s5, 128, %s818_s8, [#allocation4]  }
 0x45e   :  { %610 = dma.done.wait [#allocation4], 128  }
 0x45f   :  { %611 = vsyncadd [#allocation4], 4294967168 }
 0x460   :  { %612 = dma.done.wait [#allocation10], 256  }
 0x461   :  { %613 = vsyncadd [#allocation10], 4294967040 }
 0x462   :  { %386 = vsyncpa [#allocation3], 1 }
 0x463   :  { %387 = vsyncpa [#allocation6], 1 }
 0x464   :  { %388 = vsyncpa [#allocation4], 1 }
 0x465   :  { %389 = vsyncpa [#allocation10], 1 }

</bundles_post_ra>
